<compile_context>
chip_gen: v7x
topology: tpu7x:2x2x1
jax: 0.10.0
libtpu: 0.0.40
codegen_flags: <defaults>
</compile_context>

<pallas_src>
import functools

import jax
import jax.numpy as jnp
from jax.experimental import pallas as pl
from jax.experimental.pallas import tpu as pltpu

_LANE = 128
_SUBLANE = 8


# ---------------------------------------------------------------------------
# Small helpers
# ---------------------------------------------------------------------------
def _round_up(x, m):
    return (x + m - 1) // m * m


def _vmem_cap_bytes():
    try:
        return int(pltpu.get_tpu_info().vmem_capacity_bytes)
    except Exception:
        return 64 * 1024 * 1024  # v7x floor; conservative default


def _vmem_limit(need_bytes):
    """Explicit scoped-VMEM limit sized to the actual blocks, with headroom,
    clamped below the physical per-core VMEM (64 MiB on v7x)."""
    cap = min(_vmem_cap_bytes(), 128 << 20) - (2 << 20)
    limit = max(int(need_bytes) * 2 + (4 << 20), 16 << 20)
    return max(min(limit, cap), 1 << 20)


def _single_buffered_spec(block_shape, index_map):
    # Grid-invariant (or slowly varying) blocks: single-buffer them so their
    # VMEM footprint is not doubled for zero benefit (matters most on v7x).
    try:
        return pl.BlockSpec(block_shape, index_map,
                            pipeline_mode=pl.Buffered(1))
    except TypeError:  # older BlockSpec signature without pipeline_mode
        return pl.BlockSpec(block_shape, index_map)


def _sigmoid(x):
    # sigmoid(x) == 0.5 * tanh(0.5 * x) + 0.5 : one EUP op instead of
    # exp + reciprocal (jax.nn.sigmoid).  Mathematically exact.
    return 0.5 * jnp.tanh(0.5 * x) + 0.5


# ---------------------------------------------------------------------------
# Input projection:  gates_in = x2d @ W_ih^T + (b_ih + b_hh)
# ---------------------------------------------------------------------------
def _proj_kernel(x_ref, w_ref, b_ref, o_ref):
    # x_ref: (tm, D), w_ref: (D, tn), b_ref: (1, tn), o_ref: (tm, tn).
    o_ref[...] = (
        jnp.dot(x_ref[...], w_ref[...], preferred_element_type=jnp.float32)
        + b_ref[...]
    ).astype(o_ref.dtype)


def _input_projection(x2d, w_ih_t, bias, out_dtype=jnp.float32):
    """x2d: (R, D) -> (R, G), R = T*Bp (multiple of 8), G = 4*Hp."""
    R, D = x2d.shape
    _, G = w_ih_t.shape

    # Row tile: 512 is near the HBM roofline sweet spot; pad R up to a
    # multiple of tm instead of falling back to one giant block.
    tm = min(512, R)
    R_pad = _round_up(R, tm)
    if R_pad != R:
        x2d = jnp.pad(x2d, ((0, R_pad - R), (0, 0)))
    # 4H tile: Hp % 128 == 0 after weight prep, so G % 512 == 0.
    tn = 512 if G % 512 == 0 else G
    nr, nc = R_pad // tm, G // tn

    need = (2 * tm * D * x2d.dtype.itemsize          # x tile (double-buffered)
            + 1 * D * tn * w_ih_t.dtype.itemsize     # weight (single-buffered)
            + 1 * tn * 4                             # bias   (single-buffered)
            + 2 * tm * tn * jnp.dtype(out_dtype).itemsize)  # out (double)

    out = pl.pallas_call(
        _proj_kernel,
        out_shape=jax.ShapeDtypeStruct((R_pad, G), out_dtype),
        grid_spec=pltpu.PrefetchScalarGridSpec(
            num_scalar_prefetch=0,
            # 4H-tile outer so the weight/bias block stays resident across the
            # inner row sweep (only nc weight DMAs total).
            grid=(nc, nr),
            in_specs=[
                pl.BlockSpec((tm, D), lambda j, i: (i, 0)),
                _single_buffered_spec((D, tn), lambda j, i: (0, j)),
                _single_buffered_spec((1, tn), lambda j, i: (0, j)),
            ],
            out_specs=pl.BlockSpec((tm, tn), lambda j, i: (i, j)),
        ),
        compiler_params=pltpu.CompilerParams(
            dimension_semantics=("parallel", "parallel"),
            vmem_limit_bytes=_vmem_limit(need),
        ),
    )(x2d, w_ih_t, bias)
    return out[:R] if R_pad != R else out


# ---------------------------------------------------------------------------
# Recurrence: per time step only  h_prev @ W_hh^T  plus gate nonlinearities.
# ---------------------------------------------------------------------------
def _lstm_recurrent_kernel(gin_ref, whh_ref, y_ref, h_sc, c_sc, *, unroll):
    """One (batch-block, time-block) tile of a single LSTM layer.

    gin_ref : (Tt, Bt, 4H)   precomputed x@W_ih^T + bias for this block
    whh_ref : (H, 4H)        pre-transposed hidden-hidden weights (resident)
    y_ref   : (Tt, Bt, H)    output hidden states for this block
    h_sc/c_sc: (Bt, H) f32   state carried across the sequential time axis
    """
    @pl.when(pl.program_id(1) == 0)        # new batch block -> reset state
    def _():
        h_sc[...] = jnp.zeros_like(h_sc)
        c_sc[...] = jnp.zeros_like(c_sc)

    H = h_sc.shape[1]
    Tt = gin_ref.shape[0]

    def step(t, carry):
        h_prev = h_sc[...]                       # (Bt, H) f32
        c_prev = c_sc[...]                       # (Bt, H) f32
        # Recurrent matmul in the weights' native dtype (bf16-friendly),
        # accumulated in f32; x-projection part is already precomputed.
        gates = gin_ref[t].astype(jnp.float32) + jnp.dot(
            h_prev.astype(whh_ref.dtype), whh_ref[...],
            preferred_element_type=jnp.float32)  # (Bt, 4H)

        i_g = _sigmoid(gates[:, 0 * H:1 * H])
        f_g = _sigmoid(gates[:, 1 * H:2 * H])
        g_g = jnp.tanh(gates[:, 2 * H:3 * H])
        o_g = _sigmoid(gates[:, 3 * H:4 * H])

        c_new = f_g * c_prev + i_g * g_g
        h_new = o_g * jnp.tanh(c_new)

        c_sc[...] = c_new
        h_sc[...] = h_new
        y_ref[t] = h_new.astype(y_ref.dtype)
        return carry

    jax.lax.fori_loop(0, Tt, step, 0, unroll=unroll)


def _pick_time_block(T, Bt, H, gin_itemsize, out_itemsize, budget_bytes):
    """Largest divisor of T whose double-buffered gin/out blocks fit budget."""
    per_step = 2 * Bt * 4 * H * gin_itemsize + 2 * Bt * H * out_itemsize
    cap = max(1, budget_bytes // max(per_step, 1))
    cap = min(cap, 128, T)  # keep compile time / unroll sane
    for tb in range(cap, 0, -1):
        if T % tb == 0:
            return tb
    return 1


def _lstm_recurrence(gates_in, w_hh_t, out_dtype):
    """gates_in: (T, B, 4H), w_hh_t: (H, 4H) -> (T, B, H) out_dtype."""
    T, B, G = gates_in.shape
    H = G // 4

    # Batch split (only when it keeps tiles sublane-aligned): the batch axis
    # is independent, so multi-TensorCore chips (v7x) can take half each.
    nb = 2 if (B >= 16 and (B // 2) % _SUBLANE == 0) else 1
    Bt = B // nb

    cap = min(_vmem_cap_bytes(), 128 << 20)
    whh_bytes = H * G * w_hh_t.dtype.itemsize          # single-buffered
    scratch_bytes = 2 * Bt * H * 4
    budget = max(cap // 2 - whh_bytes - scratch_bytes, 1 << 20)
    Tt = _pick_time_block(T, Bt, H, gates_in.dtype.itemsize,
                          jnp.dtype(out_dtype).itemsize, budget)

    # Partial unroll: fully unrolling a long time block with wide (Bt,4H)
    # live gates spills the 64-entry vreg file; unroll fully only when small.
    step_vregs = pl.cdiv(Bt, _SUBLANE) * pl.cdiv(G, _LANE)
    unroll = Tt if step_vregs <= 8 else min(Tt, 4)

    need = (2 * Tt * Bt * G * gates_in.dtype.itemsize   # gin (double-buffered)
            + whh_bytes                                 # W_hh (single)
            + 2 * Tt * Bt * H * jnp.dtype(out_dtype).itemsize  # out (double)
            + scratch_bytes)

    kernel = functools.partial(_lstm_recurrent_kernel, unroll=int(unroll))
    return pl.pallas_call(
        kernel,
        out_shape=jax.ShapeDtypeStruct((T, B, H), out_dtype),
        grid_spec=pltpu.PrefetchScalarGridSpec(
            num_scalar_prefetch=0,
            grid=(nb, T // Tt),
            in_specs=[
                pl.BlockSpec((Tt, Bt, G), lambda b, t: (t, b, 0)),
                # Constant block: resident in VMEM across the whole grid,
                # single-buffered (double-buffering an invariant block wastes
                # VMEM -- critical on v7x's 64 MiB).
                _single_buffered_spec((H, G), lambda b, t: (0, 0)),
            ],
            out_specs=pl.BlockSpec((Tt, Bt, H), lambda b, t: (t, b, 0)),
            scratch_shapes=[
                pltpu.VMEM((Bt, H), jnp.float32),   # h state
                pltpu.VMEM((Bt, H), jnp.float32),   # c state
            ],
        ),
        compiler_params=pltpu.CompilerParams(
            # Batch blocks are independent; time carries state through
            # scratch and must stay sequential.
            dimension_semantics=("parallel", "arbitrary"),
            vmem_limit_bytes=_vmem_limit(need),
        ),
    )(gates_in, w_hh_t)


# ---------------------------------------------------------------------------
# One-time parameter prep (hoisted out of the forward path)
# ---------------------------------------------------------------------------
def prepare_lstm_params(params):
    """Pre-transpose weights, fold biases, and gate-blockwise pad the hidden
    size to a multiple of 128 so every kernel tile is lane-dense.  Padded
    hidden units receive all-zero weights/bias, so their h/c stay exactly 0
    and do not perturb the real units."""
    prepared = []
    for (w_ih, w_hh, b_ih, b_hh) in params:
        fourH, H = w_hh.shape
        assert fourH == 4 * H
        Hp = _round_up(H, _LANE)

        def pad_gate_rows(w, hp=Hp, h=H):
            # (4H, X) -> (4Hp, X), zero-padding each of the 4 gate blocks.
            w4 = w.reshape(4, h, -1)
            w4 = jnp.pad(w4, ((0, 0), (0, hp - h), (0, 0)))
            return w4.reshape(4 * hp, -1)

        w_ih_p = pad_gate_rows(w_ih)                          # (4Hp, D)
        w_hh_p = pad_gate_rows(w_hh)                          # (4Hp, H)
        w_hh_p = jnp.pad(w_hh_p, ((0, 0), (0, Hp - H)))       # (4Hp, Hp)
        bias_p = pad_gate_rows((b_ih + b_hh).reshape(fourH, 1))  # (4Hp, 1)

        prepared.append(dict(
            w_ih_t=jnp.transpose(w_ih_p),                     # (D, 4Hp)
            w_hh_t=jnp.transpose(w_hh_p),                     # (Hp, 4Hp)
            bias=jnp.transpose(bias_p).astype(jnp.float32),   # (1, 4Hp)
            hidden_size=H,
        ))
    return prepared


# ---------------------------------------------------------------------------
# Layer / block wrappers
# ---------------------------------------------------------------------------
def lstm_layer(x, layer_params, gates_dtype=jnp.float32):
    """One LSTM layer over the full sequence. x: (T, Bp, D) -> (T, Bp, H)."""
    T, Bp, D = x.shape
    w_ih_t = layer_params["w_ih_t"]
    w_hh_t = layer_params["w_hh_t"]
    bias = layer_params["bias"]
    H = layer_params["hidden_size"]
    Hp, G = w_hh_t.shape
    assert w_ih_t.shape == (D, G) and G == 4 * Hp

    # 1) Time-independent input projection, batched over all T*Bp rows.
    # TODO(synk): gates_dtype=bfloat16 halves the gates_in HBM round trip
    # (biggest win on v5e) at a small pre-activation precision cost.
    gin = _input_projection(x.reshape(T * Bp, D), w_ih_t, bias,
                            out_dtype=gates_dtype)
    gin = gin.reshape(T, Bp, G)

    # 2) Sequential recurrence (time-blocked, batch-split when possible).
    y = _lstm_recurrence(gin, w_hh_t, x.dtype)                # (T, Bp, Hp)
    return y[:, :, :H] if Hp != H else y


def lstm_block_forward(x, prepared_params):
    """Equivalent of LSTM_block.forward: returns `output` only.

    x: (T, B, input_size), seq-first (batch_first=False).
    """
    # TODO(synk): inter-layer dropout not applied (dropout=0.0 / inference).
    T, B, _ = x.shape
    Bp = _round_up(B, _SUBLANE)   # sublane-align the batch once, up front
    h = jnp.pad(x, ((0, 0), (0, Bp - B), (0, 0))) if Bp != B else x
    for layer_params in prepared_params:
        h = lstm_layer(h, layer_params)
    return h[:, :B, :] if Bp != B else h


# ---------------------------------------------------------------------------
# Params + pure-JAX reference + test
# ---------------------------------------------------------------------------
def init_lstm_params(key, input_size, hidden_size, num_layers):
    """Deterministic PyTorch-style init: U(-1/sqrt(H), 1/sqrt(H))."""
    params = []
    bound = 1.0 / jnp.sqrt(jnp.float32(hidden_size))
    for layer in range(num_layers):
        d_in = input_size if layer == 0 else hidden_size
        key, k1, k2, k3, k4 = jax.random.split(key, 5)
        w_ih = jax.random.uniform(k1, (4 * hidden_size, d_in), jnp.float32,
                                  -bound, bound)
        w_hh = jax.random.uniform(k2, (4 * hidden_size, hidden_size),
                                  jnp.float32, -bound, bound)
        b_ih = jax.random.uniform(k3, (4 * hidden_size,), jnp.float32,
                                  -bound, bound)
        b_hh = jax.random.uniform(k4, (4 * hidden_size,), jnp.float32,
                                  -bound, bound)
        params.append((w_ih, w_hh, b_ih, b_hh))
    return params


def _lstm_reference(x, params):
    """Pure-JAX reference (lax.scan) for a correctness check."""
    def layer(xs, p):
        w_ih, w_hh, b_ih, b_hh = p
        H = w_hh.shape[1]

        def step(carry, x_t):
            h, c = carry
            gates = x_t @ w_ih.T + h @ w_hh.T + b_ih + b_hh
            i = jax.nn.sigmoid(gates[:, 0 * H:1 * H])
            f = jax.nn.sigmoid(gates[:, 1 * H:2 * H])
            g = jnp.tanh(gates[:, 2 * H:3 * H])
            o = jax.nn.sigmoid(gates[:, 3 * H:4 * H])
            c = f * c + i * g
            h = o * jnp.tanh(c)
            return (h, c), h

        B = xs.shape[1]
        init = (jnp.zeros((B, H), jnp.float32), jnp.zeros((B, H), jnp.float32))
        _, ys = jax.lax.scan(step, init, xs)
        return ys

    h = x
    for p in params:
        h = layer(h, p)
    return h


if __name__ == "__main__":
    # nn.LSTM(input_size=16, hidden_size=32, num_layers=2, bias=True,
    #         batch_first=False, dropout=0.0)
    T, B = 8, 2
    input_size, hidden_size, num_layers = 16, 32, 2

    key = jax.random.PRNGKey(0)
    key, kx = jax.random.split(key)
    x = jax.random.normal(kx, (T, B, input_size), jnp.float32)  # (T, B, D)

    params = init_lstm_params(key, input_size, hidden_size, num_layers)
    prepared = prepare_lstm_params(params)   # one-time weight prep

    out = lstm_block_forward(x, prepared)
    out = jax.block_until_ready(out)
    assert out.shape == (T, B, hidden_size), out.shape

    ref = _lstm_reference(x, params)
    max_err = float(jnp.max(jnp.abs(out - ref)))
    assert jnp.allclose(out, ref, atol=1e-4, rtol=1e-4), max_err

    print("KERNEL_OK")
</pallas_src>

<mosaic_0001>
module attributes {stable_mosaic.version = 11 : i64} {
  func.func @_proj_kernel(%arg0: i32, %arg1: i32, %arg2: memref<64x16xf32, #tpu.memory_space<vmem>>, %arg3: memref<16x512xf32, #tpu.memory_space<vmem>>, %arg4: memref<1x512xf32, #tpu.memory_space<vmem>>, %arg5: memref<64x512xf32, #tpu.memory_space<vmem>>) attributes {dimension_semantics = [#tpu.dimension_semantics<parallel>, #tpu.dimension_semantics<parallel>], iteration_bounds = array<i64: 1, 1>, scalar_prefetch = 0 : i64, scratch_operands = 0 : i64, tpu.core_type = #tpu.core_type<tc>, window_params = [{transform_indices = @transform_0, window_bounds = array<i64: 64, 16>}, {pipeline_mode = #tpu.pipeline_mode<synchronous>, transform_indices = @transform_1, window_bounds = array<i64: 16, 512>}, {pipeline_mode = #tpu.pipeline_mode<synchronous>, transform_indices = @transform_2, window_bounds = array<i64: 1, 512>}, {transform_indices = @transform_3, window_bounds = array<i64: 64, 512>}]} {
    %c0 = arith.constant 0 : index
    %c0_0 = arith.constant 0 : index
    %0 = vector.load %arg2[%c0, %c0_0] : memref<64x16xf32, #tpu.memory_space<vmem>>, vector<64x16xf32>
    %c0_1 = arith.constant 0 : index
    %c0_2 = arith.constant 0 : index
    %1 = vector.load %arg3[%c0_1, %c0_2] : memref<16x512xf32, #tpu.memory_space<vmem>>, vector<16x512xf32>
    %cst = arith.constant dense<0.000000e+00> : vector<64x512xf32>
    %2 = tpu.matmul %0, %1, %cst {dimension_numbers = #tpu.dot_dimension_numbers<[1], [0], [0], [1], [0, 0, 1, 1], [], []>} : vector<64x16xf32>, vector<16x512xf32>, vector<64x512xf32> -> vector<64x512xf32>
    %c0_3 = arith.constant 0 : index
    %c0_4 = arith.constant 0 : index
    %3 = vector.load %arg4[%c0_3, %c0_4] : memref<1x512xf32, #tpu.memory_space<vmem>>, vector<1x512xf32>
    %4 = vector.broadcast %3 : vector<1x512xf32> to vector<64x512xf32>
    %5 = arith.addf %2, %4 : vector<64x512xf32>
    %c0_5 = arith.constant 0 : index
    %c0_6 = arith.constant 0 : index
    %6 = vector.load %arg5[%c0_5, %c0_6] : memref<64x512xf32, #tpu.memory_space<vmem>>, vector<64x512xf32>
    tpu.vector_store %arg5[%c0_5, %c0_6], %5 {strides = array<i32>} : memref<64x512xf32, #tpu.memory_space<vmem>>, vector<64x512xf32>,
    return
  }
  func.func @transform_0(%arg0: i32, %arg1: i32) -> (i32, i32) {
    %c0_i32 = arith.constant 0 : i32
    %c0_i32_0 = arith.constant 0 : i32
    return %arg1, %c0_i32 : i32, i32
  }
  func.func @transform_1(%arg0: i32, %arg1: i32) -> (i32, i32) {
    %c0_i32 = arith.constant 0 : i32
    %c0_i32_0 = arith.constant 0 : i32
    return %c0_i32, %arg0 : i32, i32
  }
  func.func @transform_2(%arg0: i32, %arg1: i32) -> (i32, i32) {
    %c0_i32 = arith.constant 0 : i32
    %c0_i32_0 = arith.constant 0 : i32
    return %c0_i32, %arg0 : i32, i32
  }
  func.func @transform_3(%arg0: i32, %arg1: i32) -> (i32, i32) {
    %c0_i32 = arith.constant 0 : i32
    return %arg1, %arg0 : i32, i32
  }
}

</mosaic_0001>

<bundles_post_ra>
// kernel: tpu_custom_call.1
= control target key start
LH: loop header
LB: loop body
LE: loop exit
PB: predicated region body
PF: predicated region fallthrough
CT: control target
= control target key end

     0   :  { %v404_v7 = vmov 0.0   ;;  %vm53_vm0 = vcmask 130048   ;;  %s547_s0 = inlined_call_operand.vmem [shape: f32[64,16], index: 0, kind: input, shape index: {}]   ;;  %s548_s1 = inlined_call_operand.vmem [shape: f32[16,512], index: 1, kind: input, shape index: {}]   ;;  %s549_s2 = inlined_call_operand.vmem [shape: f32[1,512], index: 2, kind: input, shape index: {}]   ;;  %s550_s3 = inlined_call_operand.hbm [shape: f32[64,512], index: 3, kind: output, shape index: {}]  }
   0x1   :  { %v24_v0 = vld [vmem:[%s548_s1 + $0x8] sm:$0xff]  ;;  %v26_v2 = vld [vmem:[%s548_s1 + $0x18] sm:$0xff]  ;;  %v23_v5 = vld [vmem:[%s548_s1] sm:$0xff]  ;;  %142 = vmatprep.mubr.f32.mxu0 %v404_v7  ;;  %255 = vmatprep.mubr.f32.mxu1 %v404_v7 }
   0x2   :  { %v28_v1 = vld [vmem:[%s548_s1 + $0x28] sm:$0xff]  ;;  %v30_v4 = vld [vmem:[%s548_s1 + $0x38] sm:$0xff]  ;;  %v27_v6 = vld [vmem:[%s548_s1 + $0x20] sm:$0xff] }
   0x3   :  { %v368_v3 = vpack.c.bf16 %v28_v1, %v24_v0  ;;  %v372_v8 = vpack.c.bf16 %v30_v4, %v26_v2  ;;  %v370_v9 = vpack.c.bf16 %v27_v6, %v23_v5  ;;  %v25_v10 = vld [vmem:[%s548_s1 + $0x10] sm:$0xff]  ;;  %v15_v13 = vld [vmem:[%s547_s0] sm:$0xff] }
   0x4   :  { %v29_v11 = vld [vmem:[%s548_s1 + $0x30] sm:$0xff] }
   0x5   :  { %369 = vmatprep.subr.bf16.mxu0 %v368_v3  ;;  %v374_v12 = vpack.c.bf16 %v29_v11, %v25_v10  ;;  %373 = vmatprep.subr.bf16.mxu1 %v372_v8 }
   0x6   :  { %371 = vmatpush1.bf16.msra.mxu0 %v370_v9 }
   0x7   :  { %375 = vmatpush1.bf16.msra.mxu1 %v374_v12 }
   0x8   :  { %8 = vsyncpa [#allocation3], 0  ;;  %v16_v14 = vld [vmem:[%s547_s0 + $0x8] sm:$0xff]  ;;  %v17_v15 = vld [vmem:[%s547_s0 + $0x10] sm:$0xff]  ;;  %v33_v21 = vlaneseq }
   0x9   :  { %352 = vmatmul.mubr.msk.f32.vlgmr.msra.gmra.mrb[0].mxu0 %vm53_vm0, %v15_v13  ;;  %v18_v16 = vld [vmem:[%s547_s0 + $0x18] sm:$0xff]  ;;  %v19_v17 = vld [vmem:[%s547_s0 + $0x20] sm:$0xff]  ;;  %v20_v18 = vld [vmem:[%s547_s0 + $0x28] sm:$0xff] }
   0xa   :  { %360 = vmatmul.mubr.msk.f32.vlgmr.msra.gmra.mrb[0].mxu1 %vm53_vm0, %v15_v13  ;;  %148 = vmatprep.mubr.f32.mxu0 %v404_v7  ;;  %v21_v19 = vld [vmem:[%s547_s0 + $0x30] sm:$0xff]  ;;  %v22_v20 = vld [vmem:[%s547_s0 + $0x38] sm:$0xff]  ;;  %v34_v22 = vshrl.u32 %v33_v21, 7  ;;  %v31_v24 = vld [vmem:[%s549_s2] sm:$0xf]  ;;  %s405_s0 = smov [#allocation2]  }
   0xb   :  { %261 = vmatprep.mubr.f32.mxu1 %v404_v7  ;;  %s341_s2 = sshll.u32 %s405_s0, 4  ;;  %s342_s2 = int_to_ptr.vmem [resolvable:$true] %s341_s2 }
   0xc   :  { %v35_v23 = vsub.s32 0, %v34_v22  ;;  %v43_v25 = vsub.s32 2, %v34_v22  ;;  %v39_v26 = vsub.s32 1, %v34_v22  ;;  %v47_v27 = vsub.s32 3, %v34_v22  ;;  %s380_s18 = scalar_lea.vmem %s342_s2, 4096  ;;  %p385_p1 = scmp.lt.s32.totalorder %s342_s2, %s342_s2 }
   0xd   :  { %353 = vmatmul.mubr.msk.f32.gmra.mrb[2].mxu0 %vm53_vm0, %v16_v14  ;;  %p381_p0 = scmp.ne.s32.totalorder %s342_s2, %s380_s18  ;;  %p386_p2 = scmp.lt.s32.totalorder %s380_s18, %s380_s18 }
   0xe   :  { %361 = vmatmul.mubr.msk.f32.gmra.mrb[2].mxu1 %vm53_vm0, %v16_v14  ;;  %154 = vmatprep.mubr.f32.mxu0 %v404_v7  ;;  %v495_v28 = vrot.slane %v31_v24, %v35_v23  ;;  %v497_v29 = vrot.slane %v31_v24, %v43_v25  ;;  %v499_v30 = vrot.slane %v31_v24, %v39_v26 }
   0xf   :  { %267 = vmatprep.mubr.f32.mxu1 %v404_v7  ;;  %v501_v31 = vrot.slane %v31_v24, %v47_v27  ;;  %p387_p3 = por %p386_p2, %p385_p1 }
  0x11   :  { %354 = vmatmul.mubr.msk.f32.gmra.mrb[4].mxu0 %vm53_vm0, %v17_v15  ;;  %p388_p4 = pnand %p387_p3, %p381_p0 }
  0x12   :  { %362 = vmatmul.mubr.msk.f32.gmra.mrb[4].mxu1 %vm53_vm0, %v17_v15  ;;  %160 = vmatprep.mubr.f32.mxu0 %v404_v7 }
  0x13   :  { %273 = vmatprep.mubr.f32.mxu1 %v404_v7 }
  0x15   :  { %355 = vmatmul.mubr.msk.f32.gmra.mrb[6].mxu0 %vm53_vm0, %v18_v16 }
  0x16   :  { %363 = vmatmul.mubr.msk.f32.gmra.mrb[6].mxu1 %vm53_vm0, %v18_v16  ;;  %166 = vmatprep.mubr.f32.mxu0 %v404_v7 }
  0x17   :  { %279 = vmatprep.mubr.f32.mxu1 %v404_v7 }
  0x19   :  { %356 = vmatmul.mubr.msk.f32.gmra.mrb[8].mxu0 %vm53_vm0, %v19_v17 }
  0x1a   :  { %364 = vmatmul.mubr.msk.f32.gmra.mrb[8].mxu1 %vm53_vm0, %v19_v17  ;;  %172 = vmatprep.mubr.f32.mxu0 %v404_v7 }
  0x1b   :  { %285 = vmatprep.mubr.f32.mxu1 %v404_v7 }
  0x1d   :  { %357 = vmatmul.mubr.msk.f32.gmra.mrb[10].mxu0 %vm53_vm0, %v20_v18 }
  0x1e   :  { %365 = vmatmul.mubr.msk.f32.gmra.mrb[10].mxu1 %vm53_vm0, %v20_v18  ;;  %178 = vmatprep.mubr.f32.mxu0 %v404_v7 }
  0x1f   :  { %291 = vmatprep.mubr.f32.mxu1 %v404_v7 }
  0x21   :  { %358 = vmatmul.mubr.msk.f32.gmra.mrb[12].mxu0 %vm53_vm0, %v21_v19 }
  0x22   :  { %366 = vmatmul.mubr.msk.f32.gmra.mrb[12].mxu1 %vm53_vm0, %v21_v19  ;;  %184 = vmatprep.mubr.f32.mxu0 %v404_v7 }
  0x23   :  { %297 = vmatprep.mubr.f32.mxu1 %v404_v7 }
  0x25   :  { %359 = vmatmul.mubr.msk.f32.gmra.mrb[14].mxu0 %vm53_vm0, %v22_v20 }
  0x26   :  { %367 = vmatmul.mubr.msk.f32.gmra.mrb[14].mxu1 %vm53_vm0, %v22_v20 }
  0xdc   :  { %v144_v32 = vpop.f32.mrb[0].mxu0 }
  0xdd   :  { %v145_v33 = vadd.f32 %v144_v32, %v495_v28  ;;  %v257_v34 = vpop.f32.mrb[0].mxu1  ;;  %v146_v35 = vpop.f32.mrb[1].mxu0 }
  0xde   :  { %v258_v36 = vadd.f32 %v257_v34, %v497_v29  ;;  %v147_v37 = vadd.f32 %v146_v35, %v499_v30  ;;  %v259_v38 = vpop.f32.mrb[1].mxu1 }
  0xdf   :  { %304 = vst [vmem:[#allocation2] sm:$0xff] %v145_v33  ;;  %v260_v39 = vadd.f32 %v259_v38, %v501_v31 }
  0xe0   :  { %306 = vst [vmem:[#allocation2 + $0x10] sm:$0xff] %v258_v36  ;;  %305 = vst [vmem:[#allocation2 + $0x8] sm:$0xff] %v147_v37  ;;  %v150_v40 = vpop.f32.mrb[2].mxu0 }
  0xe1   :  { %307 = vst [vmem:[#allocation2 + $0x18] sm:$0xff] %v260_v39  ;;  %v151_v41 = vadd.f32 %v150_v40, %v495_v28  ;;  %v263_v42 = vpop.f32.mrb[2].mxu1  ;;  %v152_v43 = vpop.f32.mrb[3].mxu0 }
  0xe2   :  { %v264_v44 = vadd.f32 %v263_v42, %v497_v29  ;;  %v153_v45 = vadd.f32 %v152_v43, %v499_v30  ;;  %v265_v46 = vpop.f32.mrb[3].mxu1 }
  0xe3   :  { %308 = vst [vmem:[#allocation2 + $0x20] sm:$0xff] %v151_v41  ;;  %v266_v47 = vadd.f32 %v265_v46, %v501_v31 }
  0xe4   :  { %310 = vst [vmem:[#allocation2 + $0x30] sm:$0xff] %v264_v44  ;;  %309 = vst [vmem:[#allocation2 + $0x28] sm:$0xff] %v153_v45  ;;  %v156_v48 = vpop.f32.mrb[4].mxu0 }
  0xe5   :  { %311 = vst [vmem:[#allocation2 + $0x38] sm:$0xff] %v266_v47  ;;  %v157_v49 = vadd.f32 %v156_v48, %v495_v28  ;;  %v269_v50 = vpop.f32.mrb[4].mxu1  ;;  %v158_v51 = vpop.f32.mrb[5].mxu0 }
  0xe6   :  { %v270_v52 = vadd.f32 %v269_v50, %v497_v29  ;;  %v159_v53 = vadd.f32 %v158_v51, %v499_v30  ;;  %v271_v54 = vpop.f32.mrb[5].mxu1 }
  0xe7   :  { %312 = vst [vmem:[#allocation2 + $0x40] sm:$0xff] %v157_v49  ;;  %v272_v55 = vadd.f32 %v271_v54, %v501_v31 }
  0xe8   :  { %314 = vst [vmem:[#allocation2 + $0x50] sm:$0xff] %v270_v52  ;;  %313 = vst [vmem:[#allocation2 + $0x48] sm:$0xff] %v159_v53  ;;  %v162_v56 = vpop.f32.mrb[6].mxu0 }
  0xe9   :  { %315 = vst [vmem:[#allocation2 + $0x58] sm:$0xff] %v272_v55  ;;  %v163_v57 = vadd.f32 %v162_v56, %v495_v28  ;;  %v275_v58 = vpop.f32.mrb[6].mxu1  ;;  %v164_v59 = vpop.f32.mrb[7].mxu0 }
  0xea   :  { %v276_v60 = vadd.f32 %v275_v58, %v497_v29  ;;  %v165_v61 = vadd.f32 %v164_v59, %v499_v30  ;;  %v277_v62 = vpop.f32.mrb[7].mxu1 }
  0xeb   :  { %316 = vst [vmem:[#allocation2 + $0x60] sm:$0xff] %v163_v57  ;;  %v278_v63 = vadd.f32 %v277_v62, %v501_v31 }
  0xec   :  { %318 = vst [vmem:[#allocation2 + $0x70] sm:$0xff] %v276_v60  ;;  %317 = vst [vmem:[#allocation2 + $0x68] sm:$0xff] %v165_v61  ;;  %v168_v0 = vpop.f32.mrb[8].mxu0 }
  0xed   :  { %319 = vst [vmem:[#allocation2 + $0x78] sm:$0xff] %v278_v63  ;;  %v169_v1 = vadd.f32 %v168_v0, %v495_v28  ;;  %v281_v2 = vpop.f32.mrb[8].mxu1  ;;  %v170_v3 = vpop.f32.mrb[9].mxu0 }
  0xee   :  { %v282_v4 = vadd.f32 %v281_v2, %v497_v29  ;;  %v171_v5 = vadd.f32 %v170_v3, %v499_v30  ;;  %v283_v6 = vpop.f32.mrb[9].mxu1 }
  0xef   :  { %320 = vst [vmem:[#allocation2 + $0x80] sm:$0xff] %v169_v1  ;;  %v284_v7 = vadd.f32 %v283_v6, %v501_v31 }
  0xf0   :  { %322 = vst [vmem:[#allocation2 + $0x90] sm:$0xff] %v282_v4  ;;  %321 = vst [vmem:[#allocation2 + $0x88] sm:$0xff] %v171_v5  ;;  %v174_v8 = vpop.f32.mrb[10].mxu0 }
  0xf1   :  { %323 = vst [vmem:[#allocation2 + $0x98] sm:$0xff] %v284_v7  ;;  %v175_v9 = vadd.f32 %v174_v8, %v495_v28  ;;  %v287_v10 = vpop.f32.mrb[10].mxu1  ;;  %v176_v11 = vpop.f32.mrb[11].mxu0 }
  0xf2   :  { %v288_v12 = vadd.f32 %v287_v10, %v497_v29  ;;  %v177_v13 = vadd.f32 %v176_v11, %v499_v30  ;;  %v289_v14 = vpop.f32.mrb[11].mxu1 }
  0xf3   :  { %324 = vst [vmem:[#allocation2 + $0xa0] sm:$0xff] %v175_v9  ;;  %v290_v15 = vadd.f32 %v289_v14, %v501_v31 }
  0xf4   :  { %326 = vst [vmem:[#allocation2 + $0xb0] sm:$0xff] %v288_v12  ;;  %325 = vst [vmem:[#allocation2 + $0xa8] sm:$0xff] %v177_v13  ;;  %v180_v16 = vpop.f32.mrb[12].mxu0 }
  0xf5   :  { %327 = vst [vmem:[#allocation2 + $0xb8] sm:$0xff] %v290_v15  ;;  %v181_v17 = vadd.f32 %v180_v16, %v495_v28  ;;  %v293_v18 = vpop.f32.mrb[12].mxu1  ;;  %v182_v19 = vpop.f32.mrb[13].mxu0 }
  0xf6   :  { %v294_v20 = vadd.f32 %v293_v18, %v497_v29  ;;  %v183_v21 = vadd.f32 %v182_v19, %v499_v30  ;;  %v295_v22 = vpop.f32.mrb[13].mxu1 }
  0xf7   :  { %328 = vst [vmem:[#allocation2 + $0xc0] sm:$0xff] %v181_v17  ;;  %v296_v23 = vadd.f32 %v295_v22, %v501_v31 }
  0xf8   :  { %330 = vst [vmem:[#allocation2 + $0xd0] sm:$0xff] %v294_v20  ;;  %329 = vst [vmem:[#allocation2 + $0xc8] sm:$0xff] %v183_v21  ;;  %v186_v24 = vpop.f32.mrb[14].mxu0 }
  0xf9   :  { %331 = vst [vmem:[#allocation2 + $0xd8] sm:$0xff] %v296_v23  ;;  %v187_v25 = vadd.f32 %v186_v24, %v495_v28  ;;  %v299_v26 = vpop.f32.mrb[14].mxu1  ;;  %v188_v27 = vpop.f32.mrb[15].mxu0 }
  0xfa   :  { %v300_v32 = vadd.f32 %v299_v26, %v497_v29  ;;  %v189_v33 = vadd.f32 %v188_v27, %v499_v30  ;;  %v301_v34 = vpop.f32.mrb[15].mxu1 }
  0xfb   :  { %332 = vst [vmem:[#allocation2 + $0xe0] sm:$0xff] %v187_v25  ;;  %v302_v35 = vadd.f32 %v301_v34, %v501_v31 }
  0xfc   :  { %334 = vst [vmem:[#allocation2 + $0xf0] sm:$0xff] %v300_v32  ;;  %333 = vst [vmem:[#allocation2 + $0xe8] sm:$0xff] %v189_v33 }
  0xfd   :  { %335 = vst [vmem:[#allocation2 + $0xf8] sm:$0xff] %v302_v35 }
  0xfe   :  { %391 = shalt.err (!%p388_p4)
}
  0xff   :  { %s392_s21 = scalar_lea.hbm %s550_s3, 4096 }
 0x100   :  { %p393_p5 = scmp.ne.s32.totalorder %s550_s3, %s392_s21  ;;  %p396_p6 = scmp.lt.u32.totalorder %s392_s21, %s550_s3 }
 0x102   :  { %p398_p7 = pnand %p396_p6, %p393_p5 }
 0x104   :  { %401 = shalt.err (!%p398_p7)
}
 0x105   :  { %s406_s26 = smov 512   ;;  %s407_s27 = smov 32  }
 0x106   :  { %347 = dma.vmem_to_hbm [thread:$0]  %s342_s2, 4096, %s550_s3, [#allocation3], %s406_s26, %s406_s26, %s407_s27  }
 0x107   :  { %402 = dma.done.wait [#allocation3], 4096  }
 0x108   :  { %403 = vsyncadd [#allocation3], 4294963200 }
 0x109   :  { %351 = vsyncpa [#allocation3], 1 }

</bundles_post_ra>
